<compile_context>
chip_gen: v7x
topology: tpu7x:2x2x1
jax: 0.10.0
libtpu: 0.0.40
codegen_flags: <defaults>
</compile_context>

<pallas_src>
import jax
import jax.numpy as jnp
from jax.experimental import pallas as pl
from jax.experimental.pallas import tpu as pltpu


def _upsample_conv_kernel(x_ref, w_ref, b_ref, o_ref):
    # x_ref: (1, R, W, C)        un-upsampled input rows (NHWC)
    # w_ref: (C, 2*Co)           1x1 conv weight, transposed and width-duplicated [w | w]
    # b_ref: (1, 2*Co)           bias, width-duplicated
    # o_ref: (1, R, 2, W, 2*Co)  conv result with nearest-2x duplication baked into layout:
    #                            axis 2 = height dup, last dim = [conv, conv] (width dup)
    _, R, W, C = x_ref.shape
    K = w_ref.shape[1]  # K = 2*Co

    if W % 8 == 0 or R == 1:
        # (R, W) -> (R*W) preserves the (8,128) sublane tiling -> free reshape.
        x = x_ref[0].reshape(R * W, C)
        conv = jnp.dot(x, w_ref[...], preferred_element_type=jnp.float32)
        conv = (conv + b_ref[...]).astype(o_ref.dtype)   # cast once, on the small tensor
        conv = conv.reshape(R, W, K)
    else:
        # Avoid the relayout copy a (R,W)->(R*W) reshape would cost when W % 8 != 0:
        # contract the last axis of the 3-D tile directly.
        conv = jax.lax.dot_general(
            x_ref[0], w_ref[...],
            dimension_numbers=(((2,), (0,)), ((), ())),
            preferred_element_type=jnp.float32)
        conv = (conv + b_ref[...]).astype(o_ref.dtype)

    # Height duplication: broadcast over a size-2 axis; single full-block store.
    o_ref[0] = jnp.broadcast_to(conv[:, None], (R, 2, W, K))


def _vmem_limit_bytes():
    """Generation-gated VMEM budget (v5e/v6e: 128 MiB physical; v7x: 64 MiB)."""
    try:
        cap = int(pltpu.get_tpu_info().vmem_capacity_bytes)
    except Exception:
        cap = 128 * 1024 * 1024
    # ~60% of physical VMEM, capped at 64 MiB: ~64 MiB on v5e/v6e, ~38 MiB on v7x,
    # leaving headroom for Mosaic scratch and the double-buffered in/out blocks.
    return min(64 * 1024 * 1024, (cap * 3) // 5)


def _pick_rows_per_block(H, per_row_bytes, target_bytes, max_bytes):
    """Divisor of H whose combined block byte-size is closest to target (and <= max)."""
    divisors = [d for d in range(1, H + 1) if H % d == 0]
    fitting = [d for d in divisors if d * per_row_bytes <= max_bytes]
    if not fitting:
        return 1
    r_target = max(1, target_bytes // max(per_row_bytes, 1))
    # Closest to the target; break ties toward the larger block.
    return min(fitting, key=lambda d: (abs(d - r_target), -d))


def upsample_conv_nhwc(x_nhwc, weight, bias, out_dtype=None):
    """Nearest-2x upsample + 1x1 conv (C -> C//2), NHWC in / NHWC out.

    x_nhwc: (N, H, W, C); weight: (Co, C, 1, 1); bias: (Co,). Returns (N, 2H, 2W, Co).
    """
    N, H, W, C = x_nhwc.shape
    Co = weight.shape[0]
    assert weight.shape == (Co, C, 1, 1) and bias.shape == (Co,)
    out_dtype = x_nhwc.dtype if out_dtype is None else out_dtype
    # TODO(synk): on v5e, pass out_dtype=jnp.bfloat16 when model numerics allow --
    # the output is ~2/3 of the kernel's HBM traffic.

    w2 = jnp.transpose(weight[:, :, 0, 0], (1, 0))                      # (C, Co)
    w_dup = jnp.concatenate([w2, w2], axis=1)                           # (C, 2*Co): MXU emits width dup
    b_dup = jnp.concatenate([bias, bias]).astype(jnp.float32).reshape(1, 2 * Co)

    in_item = jnp.dtype(x_nhwc.dtype).itemsize
    out_item = jnp.dtype(out_dtype).itemsize
    # Bytes per input row: one input row + the two duplicated output rows.
    per_row = W * C * in_item + 4 * W * Co * out_item
    vmem_limit = _vmem_limit_bytes()
    target = min(8 << 20, vmem_limit // 4)      # combined in+out bytes per grid step
    R = _pick_rows_per_block(H, per_row, target, max_bytes=vmem_limit // 3)

    # TODO(synk): for layers with Co < 64 the output's last dim (2*Co) is < 128 lanes,
    # so stores are lane-masked; pad Co up to 64/128 there if it shows up in profiles.
    conv5d = pl.pallas_call(
        _upsample_conv_kernel,
        out_shape=jax.ShapeDtypeStruct((N, H, 2, W, 2 * Co), out_dtype),
        grid_spec=pltpu.PrefetchScalarGridSpec(
            num_scalar_prefetch=0,
            grid=(N, H // R),
            in_specs=[
                pl.BlockSpec((1, R, W, C), lambda n, h: (n, h, 0, 0)),
                pl.BlockSpec((C, 2 * Co), lambda n, h: (0, 0)),
                pl.BlockSpec((1, 2 * Co), lambda n, h: (0, 0)),
            ],
            out_specs=pl.BlockSpec((1, R, 2, W, 2 * Co),
                                   lambda n, h: (n, h, 0, 0, 0)),
        ),
        # TODO(synk): on v7x switch one grid axis to pltpu.CORE_PARALLEL (2 TCs/chip);
        # plain "parallel" is safe on every generation but leaves one v7x core idle.
        compiler_params=pltpu.CompilerParams(
            dimension_semantics=("parallel", "parallel"),
            vmem_limit_bytes=vmem_limit,
        ),
    )(x_nhwc, w_dup, b_dup)

    # (N, H, 2, W, 2*Co) row-major is bit-identical to NHWC (N, 2H, 2W, Co): free reshape.
    return conv5d.reshape(N, 2 * H, 2 * W, Co)


def upsample_forward_nhwc(x_nhwc, fmap_nhwc, weight, bias):
    """NHWC end-to-end variant (preferred when the surrounding model is NHWC):
    avoids both boundary transposes; concat happens on the contiguous last axis."""
    conv = upsample_conv_nhwc(x_nhwc, weight, bias)
    return jnp.concatenate([conv, fmap_nhwc], axis=-1)


def upsample_forward(x_nchw, fmap_nchw, weight, bias):
    """Equivalent of UpSample.forward(x, feature_map) with the PyTorch NCHW interface.

    x_nchw: (N, C, H, W); fmap_nchw: (N, C//2, 2H, 2W); weight: (C//2, C, 1, 1); bias: (C//2,)
    Returns NCHW (N, C, 2H, 2W).
    """
    N, C, H, W = x_nchw.shape
    Co = C // 2
    assert weight.shape == (Co, C, 1, 1)
    assert fmap_nchw.shape == (N, Co, 2 * H, 2 * W)

    x_nhwc = jnp.transpose(x_nchw, (0, 2, 3, 1))          # feature map never enters the kernel
    conv_nhwc = upsample_conv_nhwc(x_nhwc, weight, bias)
    conv_nchw = jnp.transpose(conv_nhwc, (0, 3, 1, 2))
    # Channel concat with the skip stays in NCHW (contiguous; no fmap layout round-trip,
    # no lane-masked partial-channel stores in the kernel).
    # TODO(synk): if the surrounding model can stay NHWC end-to-end, use
    # upsample_forward_nhwc instead -- the two boundary transposes here move roughly
    # 2x the HBM bytes the kernel itself does.
    return jnp.concatenate([conv_nchw, fmap_nchw], axis=1)


def upsample_ref(x, fmap, weight, bias):
    """Plain-JAX reference of the PyTorch forward (for correctness check)."""
    up = jnp.repeat(jnp.repeat(x, 2, axis=2), 2, axis=3)
    conv = jnp.einsum("nchw,oc->nohw", up, weight[:, :, 0, 0]) + bias[None, :, None, None]
    return jnp.concatenate([conv, fmap], axis=1)


if __name__ == "__main__":
    key = jax.random.PRNGKey(0)
    k1, k2, k3, k4 = jax.random.split(key, 4)

    N, C, H, W = 2, 4, 16, 16
    Co = C // 2

    x = jax.random.normal(k1, (N, C, H, W), jnp.float32)
    feature_map = jax.random.normal(k2, (N, Co, 2 * H, 2 * W), jnp.float32)

    # Deterministic Conv2d(channel, channel // 2, 1, 1) parameters (PyTorch-style uniform init).
    bound = 1.0 / (C ** 0.5)
    weight = jax.random.uniform(k3, (Co, C, 1, 1), jnp.float32, -bound, bound)
    bias = jax.random.uniform(k4, (Co,), jnp.float32, -bound, bound)

    out = upsample_forward(x, feature_map, weight, bias)
    out = jax.block_until_ready(out)

    ref = upsample_ref(x, feature_map, weight, bias)
    assert out.shape == (N, C, 2 * H, 2 * W), out.shape
    assert jnp.allclose(out, ref, atol=1e-5, rtol=1e-5)

    print("KERNEL_OK")
</pallas_src>

<mosaic_0001>
module attributes {stable_mosaic.version = 11 : i64} {
  func.func @_upsample_conv_kernel(%arg0: i32, %arg1: i32, %arg2: memref<1x16x16x4xf32, #tpu.memory_space<vmem>>, %arg3: memref<4x4xf32, #tpu.memory_space<vmem>>, %arg4: memref<1x4xf32, #tpu.memory_space<vmem>>, %arg5: memref<1x16x2x16x4xf32, #tpu.memory_space<vmem>>) attributes {dimension_semantics = [#tpu.dimension_semantics<parallel>, #tpu.dimension_semantics<parallel>], iteration_bounds = array<i64: 2, 1>, scalar_prefetch = 0 : i64, scratch_operands = 0 : i64, tpu.core_type = #tpu.core_type<tc>, window_params = [{transform_indices = @transform_0, window_bounds = array<i64: 1, 16, 16, 4>}, {pipeline_mode = #tpu.pipeline_mode<synchronous>, transform_indices = @transform_1, window_bounds = array<i64: 4, 4>}, {pipeline_mode = #tpu.pipeline_mode<synchronous>, transform_indices = @transform_2, window_bounds = array<i64: 1, 4>}, {transform_indices = @transform_3, window_bounds = array<i64: 1, 16, 2, 16, 4>}]} {
    %c0 = arith.constant 0 : index
    %c0_0 = arith.constant 0 : index
    %c0_1 = arith.constant 0 : index
    %c0_2 = arith.constant 0 : index
    %0 = vector.load %arg2[%c0, %c0_0, %c0_1, %c0_2] : memref<1x16x16x4xf32, #tpu.memory_space<vmem>>, vector<1x16x16x4xf32>
    %1 = vector.shape_cast %0 : vector<1x16x16x4xf32> to vector<16x16x4xf32>
    %2 = vector.shape_cast %1 : vector<16x16x4xf32> to vector<256x4xf32>
    %c0_3 = arith.constant 0 : index
    %c0_4 = arith.constant 0 : index
    %3 = vector.load %arg3[%c0_3, %c0_4] : memref<4x4xf32, #tpu.memory_space<vmem>>, vector<4x4xf32>
    %cst = arith.constant dense<0.000000e+00> : vector<256x4xf32>
    %4 = tpu.matmul %2, %3, %cst {dimension_numbers = #tpu.dot_dimension_numbers<[1], [0], [0], [1], [0, 0, 1, 1], [], []>} : vector<256x4xf32>, vector<4x4xf32>, vector<256x4xf32> -> vector<256x4xf32>
    %c0_5 = arith.constant 0 : index
    %c0_6 = arith.constant 0 : index
    %5 = vector.load %arg4[%c0_5, %c0_6] : memref<1x4xf32, #tpu.memory_space<vmem>>, vector<1x4xf32>
    %6 = vector.broadcast %5 : vector<1x4xf32> to vector<256x4xf32>
    %7 = arith.addf %4, %6 : vector<256x4xf32>
    %8 = vector.shape_cast %7 : vector<256x4xf32> to vector<16x16x4xf32>
    %9 = vector.shape_cast %8 : vector<16x16x4xf32> to vector<16x1x16x4xf32>
    %10 = vector.shape_cast %9 : vector<16x1x16x4xf32> to vector<16x1x16x4xf32>
    %11 = vector.broadcast %10 : vector<16x1x16x4xf32> to vector<16x2x16x4xf32>
    %c0_7 = arith.constant 0 : index
    %c0_8 = arith.constant 0 : index
    %c0_9 = arith.constant 0 : index
    %c0_10 = arith.constant 0 : index
    %c0_11 = arith.constant 0 : index
    %12 = vector.load %arg5[%c0_7, %c0_8, %c0_9, %c0_10, %c0_11] : memref<1x16x2x16x4xf32, #tpu.memory_space<vmem>>, vector<1x16x2x16x4xf32>
    %13 = vector.shape_cast %12 : vector<1x16x2x16x4xf32> to vector<16x2x16x4xf32>
    %14 = vector.shape_cast %11 : vector<16x2x16x4xf32> to vector<1x16x2x16x4xf32>
    tpu.vector_store %arg5[%c0_7, %c0_8, %c0_9, %c0_10, %c0_11], %14 {strides = array<i32>} : memref<1x16x2x16x4xf32, #tpu.memory_space<vmem>>, vector<1x16x2x16x4xf32>,
    return
  }
  func.func @transform_0(%arg0: i32, %arg1: i32) -> (i32, i32, i32, i32) {
    %c0_i32 = arith.constant 0 : i32
    %c0_i32_0 = arith.constant 0 : i32
    %c0_i32_1 = arith.constant 0 : i32
    return %arg0, %arg1, %c0_i32, %c0_i32_0 : i32, i32, i32, i32
  }
  func.func @transform_1(%arg0: i32, %arg1: i32) -> (i32, i32) {
    %c0_i32 = arith.constant 0 : i32
    %c0_i32_0 = arith.constant 0 : i32
    %c0_i32_1 = arith.constant 0 : i32
    return %c0_i32, %c0_i32_0 : i32, i32
  }
  func.func @transform_2(%arg0: i32, %arg1: i32) -> (i32, i32) {
    %c0_i32 = arith.constant 0 : i32
    %c0_i32_0 = arith.constant 0 : i32
    %c0_i32_1 = arith.constant 0 : i32
    return %c0_i32, %c0_i32_0 : i32, i32
  }
  func.func @transform_3(%arg0: i32, %arg1: i32) -> (i32, i32, i32, i32, i32) {
    %c0_i32 = arith.constant 0 : i32
    %c0_i32_0 = arith.constant 0 : i32
    %c0_i32_1 = arith.constant 0 : i32
    %c0_i32_2 = arith.constant 0 : i32
    return %arg0, %arg1, %c0_i32, %c0_i32_0, %c0_i32_1 : i32, i32, i32, i32, i32
  }
}

</mosaic_0001>

<bundles_post_ra>
// kernel: tpu_custom_call.1
= control target key start
LH: loop header
LB: loop body
LE: loop exit
PB: predicated region body
PF: predicated region fallthrough
CT: control target
= control target key end

     0   :  { %8 = vsyncpa [#allocation3], 0  ;;  %s1698_s0 = inlined_call_operand.hbm [shape: f32[2,16,16,4], index: 0, kind: input, shape index: {}]   ;;  %s1699_s1 = inlined_call_operand.hbm [shape: f32[4,4], index: 1, kind: input, shape index: {}]   ;;  %s1700_s2 = inlined_call_operand.hbm [shape: f32[1,4], index: 2, kind: input, shape index: {}]   ;;  %s1701_s3 = inlined_call_operand.hbm [shape: f32[2,16,2,16,4], index: 3, kind: output, shape index: {}]  }
   0x1   :  { %10 = vsyncpa [#allocation3 + $0x1], 0 }
   0x2   :  { %11 = vsyncpa [#allocation6], 0 }
   0x3   :  { %12 = vsyncpa [#allocation4], 0 }
   0x4   :  { %14 = vsyncpa [#allocation4 + $0x1], 0  ;;  %s1217_s12 = smov 0   ;;  %s1219_s13 = smov 0  }
   0x5   :  { %s1221_s14 = smov 0   ;;  %s1223_s15 = smov 0  }
   0x6   :  { %s1225_s16 = smov 0   ;;  %s1227_s17 = smov 0  }
   0x7 LB: > { %s788_s18 = sadd.s32 4294967295, %s1187_s17   ;;  %s789_s19 = sadd.s32 4294967294, %s1187_s17   ;;  %s1187_s17 = sphi %s1227_s17, %s20_s17   ;;  %s1183_s16 = sphi %s1225_s16, %s1727_s16   ;;  %s1179_s15 = sphi %s1223_s15, %s1726_s15   ;;  %s1175_s14 = sphi %s1221_s14, %s1725_s14   ;;  %s1171_s13 = sphi %s1219_s13, %s1724_s13   ;;  %s1167_s12 = sphi %s1217_s12, %s1723_s12  }
   0x8   : > { %s41_s20 = sadd.s32 1, %s1175_s14  ;;  %p48_p0 = scmp.ne.s32.totalorder %s1175_s14, %s1171_s13 }
   0x9   : > { %p49_p1 = scmp.eq.s32.totalorder %s1187_s17, 0  ;;  %p54_p2 = scmp.ne.s32.totalorder %s1171_s13, %s1167_s12 }
   0xa   : > { %p1255_p3 = scmp.eq.s32.totalorder %s788_s18, 0  ;;  %p122_p4 = scmp.eq.s32.totalorder %s788_s18, 1 }
   0xb   : > { %p1259_p5 = por %p49_p1, %p48_p0  ;;  %p128_p6 = scmp.eq.s32.totalorder %s789_s19, 1 }
   0xc   : > { %s1708_s21 = scalar_select %p1255_p3, 1, 0 }
   0xd   : > { %p1265_p7 = por %p1255_p3, %p54_p2  ;;  %p1269_p8 = por %p122_p4, %p48_p0 }
   0xe   : > { %p1273_p9 = por %p128_p6, %p54_p2  ;;  %p790_p10 = scmp.ge.s32.totalorder %s1187_s17, 1 }
   0xf   : > { %s1710_s23 = scalar_select %p1265_p7, 1, 0 }
  0x10   : > { %s1711_s24 = scalar_select %p1269_p8, 1, 0 }
  0x11   : > { %s1712_s25 = scalar_select %p1273_p9, 1, 0 }
  0x12   : > { %p135_p11 = scmp.lt.s32.totalorder %s1187_s17, 3  ;;  %s1189_s27 = smov [#allocation5]  }
  0x13   : > { %s148_s28 = sshll.u32 %s1189_s27, 4  ;;  %p957_p1 = scmp.lt.s32.totalorder %s1187_s17, 2  ;;  %s149_s28 = int_to_ptr.vmem [resolvable:$true] %s148_s28 }
  0x14   : > { %p1280_p13 = pnand %p790_p10, %p135_p11  ;;  %s1190_s30 = smov [#allocation7]  }
  0x15   : > { %p1289_p4 = pnand %p957_p1, %p1259_p5  ;;  %s159_s4 = sshll.u32 %s1190_s30, 4  ;;  %s1299_s4 = int_to_ptr.vmem [resolvable:$true] %s159_s4 }
  0x16   : > { %s1713_s26 = scalar_select %p1280_p13, 1, 0 }
  0x17   : > { %p940_p0 = pneg %p1280_p13  ;;  %s1015_s8 = scalar_lea.hbm %s1699_s1, 64 }
  0x18   : > { %s1714_s29 = scalar_select %p1289_p4, 1, 0 }
  0x19   : > { %p1295_p2 = pnand %p940_p0, %p1255_p3  ;;  %p1016_p5 = scmp.ne.s32.totalorder %s1699_s1, %s1015_s8 }
  0x1a   : > { %p1022_p1 = scmp.lt.u32.totalorder %s1015_s8, %s1699_s1 }
  0x1b   : > { %p1017_p6 = pneg %p1295_p2 }
  0x1d   : > { %p1018_p10 = pnand %p1017_p6, %p1016_p5 }
  0x1f   : > { %p1019_p11 = pneg %p1018_p10 }
  0x21   : > { %p1024_p0 = pnand %p1022_p1, %p1019_p11 }
  0x23   : > { %1027 = shalt.err (!%p1024_p0)
}
  0x24   : > { %s1028_s19 = scalar_lea.vmem %s149_s28, 64  ;;  %p1036_p3 = scmp.lt.s32.totalorder %s149_s28, %s149_s28 }
  0x25   : > { %p1029_p12 = scmp.ne.s32.totalorder %s149_s28, %s1028_s19  ;;  %p1037_p7 = scmp.lt.s32.totalorder %s1028_s19, %s1028_s19 }
  0x27   : > { %p1031_p9 = pnand %p1029_p12, %p1017_p6  ;;  %p1038_p13 = por %p1037_p7, %p1036_p3 }
  0x29   : > { %p1032_p8 = pneg %p1031_p9 }
  0x2b   : > { %p1039_p4 = pnand %p1038_p13, %p1032_p8 }
  0x2d   : > { %1042 = shalt.err (!%p1039_p4)
}
  0x2e   : > { %943 = dma.hbm_to_vmem [thread:$0]  (!%p1295_p2), %s1699_s1, 64, %s149_s28, [#allocation6]  }
  0x2f   : > { %s1043_s7 = scalar_lea.hbm %s1700_s2, 16 }
  0x30   : > { %p1044_p9 = scmp.ne.s32.totalorder %s1700_s2, %s1043_s7  ;;  %p1050_p8 = scmp.lt.u32.totalorder %s1043_s7, %s1700_s2 }
  0x32   : > { %p1046_p3 = pnand %p1044_p9, %p1017_p6 }
  0x34   : > { %p1047_p7 = pneg %p1046_p3 }
  0x36   : > { %p1052_p12 = pnand %p1050_p8, %p1047_p7 }
  0x38   : > { %1055 = shalt.err (!%p1052_p12)
}
  0x39   : > { %s1056_s28 = scalar_lea.vmem %s1299_s4, 16  ;;  %s1063_s18 = scalar_lea.vmem %s1299_s4, 32 }
  0x3a   : > { %p1057_p13 = scmp.ne.s32.totalorder %s1299_s4, %s1056_s28  ;;  %p1064_p10 = scmp.lt.s32.totalorder %s1299_s4, %s1299_s4 }
  0x3b   : > { %p1065_p11 = scmp.lt.s32.totalorder %s1063_s18, %s1056_s28 }
  0x3c   : > { %p1059_p4 = pnand %p1057_p13, %p1017_p6 }
  0x3d   : > { %p1066_p1 = por %p1065_p11, %p1064_p10 }
  0x3e   : > { %p1060_p5 = pneg %p1059_p4 }
  0x40   : > { %p1067_p0 = pnand %p1066_p1, %p1060_p5 }
  0x42   : > { %1070 = shalt.err (!%p1067_p0)
}
  0x43   : > { %946 = dma.hbm_to_vmem [thread:$0]  (!%p1295_p2), %s1700_s2, 16, %s1299_s4, [#allocation6]  }
  0x44   : > { %s32_s27 = sadd.s32 1, %s1183_s16  ;;  %s170_s30 = sand.u32 1, %s1175_s14  }
  0x45   : > { %p34_p6 = scmp.ge.s32.totalorder %s32_s27, 2  ;;  %s794_s6 = sshll.u32 %s170_s30, 8 }
  0x46   : > { %s841_s7 = sshll.u32 %s1183_s16, 12  ;;  %s174_s4 = scalar_lea.vmem [#allocation2], %s794_s6 }
  0x47   : > { %s1729_s27 = smov (%p34_p6, %s32_s27), 0  ;;  %s1357_s9 = scalar_lea.hbm %s1698_s0, %s841_s7 }
  0x48   : > { %s36_s10 = ssub.s32 %s1183_s16, %s1729_s27  ;;  %s184_s11 = sshll.u32 %s174_s4, 4  ;;  %s1361_s11 = int_to_ptr.vmem [resolvable:$true] %s184_s11 }
  0x49   : > { %p39_p2 = scmp.eq.s32.totalorder %s36_s10, 0  ;;  %s1368_s18 = scalar_lea.sflag [#allocation3], %s170_s30 }
  0x4a   : > { %s1071_s19 = scalar_lea.hbm %s1357_s9, 4096  ;;  %p1716_p3 = scmp.ne.s32.totalorder %s1714_s29, 0 }
  0x4b   : > { %s1366_s28 = scalar_select %p39_p2, %s1175_s14, %s41_s20  }
  0x4c   : > { %p1072_p9 = scmp.ne.s32.totalorder %s1357_s9, %s1071_s19  ;;  %p1073_p7 = pneg %p1716_p3 }
  0x4d   : > { %s1076_s6 = scalar_lea.hbm %s1698_s0, 8192  ;;  %p1077_p13 = scmp.lt.u32.totalorder %s1357_s9, %s1698_s0 }
  0x4e   : > { %p1074_p8 = pnand %p1073_p7, %p1072_p9  ;;  %p1078_p4 = scmp.lt.u32.totalorder %s1076_s6, %s1071_s19 }
  0x4f   : > { %p1080_p10 = scmp.lt.u32.totalorder %s1071_s19, %s1357_s9 }
  0x50   : > { %p1075_p12 = pneg %p1074_p8  ;;  %p1079_p5 = por %p1078_p4, %p1077_p13 }
  0x52   : > { %p1081_p11 = por %p1080_p10, %p1079_p5 }
  0x54   : > { %p1082_p1 = pnand %p1081_p11, %p1075_p12 }
  0x56   : > { %1085 = shalt.err (!%p1082_p1)
}
  0x57   : > { %s1086_s20 = scalar_lea.vmem %s1361_s11, 4096  ;;  %s1191_s30 = smov [#allocation2]  }
  0x58   : > { %p1087_p0 = scmp.ne.s32.totalorder %s1361_s11, %s1086_s20  ;;  %s1091_s10 = sshll.u32 %s1191_s30, 4  ;;  %s1092_s10 = int_to_ptr.vmem [resolvable:$false] %s1091_s10 }
  0x59   : > { %s1093_s4 = scalar_lea.vmem %s1092_s10, 8192  ;;  %p1094_p9 = scmp.lt.s32.totalorder %s1361_s11, %s1092_s10 }
  0x5a   : > { %p1089_p6 = pnand %p1087_p0, %p1073_p7  ;;  %p1095_p8 = scmp.lt.s32.totalorder %s1093_s4, %s1086_s20 }
  0x5c   : > { %p1090_p2 = pneg %p1089_p6  ;;  %p1096_p13 = por %p1095_p8, %p1094_p9 }
  0x5e   : > { %p1097_p4 = pnand %p1096_p13, %p1090_p2 }
  0x60   : > { %1100 = shalt.err (!%p1097_p4)
}
  0x61   : > { %s1192_s19 = smov 128   ;;  %s1193_s22 = smov 8  }
  0x62   : > { %950 = dma.hbm_to_vmem [thread:$0]  (!%p1716_p3), %s1357_s9, 4096, %s1361_s11, %s1368_s18, %s1192_s19, %s1192_s19, %s1193_s22  }
  0x63   : > { %p1717_p7 = scmp.ne.s32.totalorder %s1713_s26, 0 }
  0x64   : > { %s1399_s7 = sand.u32 (!%p1717_p7), 1, %s1171_s13   ;;  %p1718_p12 = scmp.ne.s32.totalorder (!%p1717_p7), %s1710_s23, 0 }
  0x65   : > { %196 = sbr.rel (%p1717_p7) target bundleno = 376 (0x178), region = 32  ;;  %s798_s6 = sshll.u32 (!%p1717_p7), %s1399_s7, 8 }
  0x66   : > { %s199_s5 = scalar_lea.sflag (!%p1717_p7), [#allocation3], %s1399_s7  ;;  %s1403_s8 = scalar_lea.vmem (!%p1717_p7), [#allocation2], %s798_s6 }
  0x6c   : > { %1154 = dma.done.wait (%p1718_p12), %s199_s5, 4096  }
  0x6d   : > { %1156 = vsyncadd (%p1718_p12), %s199_s5, 4294963200  ;;  %p1719_p3 = scmp.ne.s32.totalorder %s1708_s21, 0 }
  0x6f   : > { %1158 = dma.done.wait (%p1719_p3), [#allocation6], 80  }
  0x70   : > { %1160 = vsyncadd (%p1719_p3), [#allocation6], 4294967216  ;;  %vm372_vm0 = vcmask 1043456   ;;  %v267_v0 = vld [vmem:[#allocation5] sm:$0xf]  ;;  %vm275_vm1 = vcmask 31744  }
  0x71   : > { %v235_v1 = vld [vmem:[%s1403_s8] sm:$0xff]  ;;  %876 = vmatprep.subr.msk.mxu0 %vm372_vm0, %v267_v0  ;;  %926 = vmatprep.subr.msk.mxu1 %vm372_vm0, %v267_v0  ;;  %v236_v3 = vld [vmem:[%s1403_s8 + $0x8] sm:$0xff]  ;;  %v237_v5 = vld [vmem:[%s1403_s8 + $0x10] sm:$0xff]  ;;  %s801_s21 = sshll.u32 %s1399_s7, 9  ;;  %s842_s26 = sshll.u32 %s1179_s15, 13 }
  0x72   : > { %v251_v2 = vld [vmem:[%s1403_s8 + $0x80] sm:$0xff]  ;;  %v252_v4 = vld [vmem:[%s1403_s8 + $0x88] sm:$0xff]  ;;  %877 = vmatpush3.msk.msra.mxu0 %vm372_vm0, %v267_v0  ;;  %927 = vmatpush3.msk.msra.mxu1 %vm372_vm0, %v267_v0  ;;  %v253_v6 = vld [vmem:[%s1403_s8 + $0x90] sm:$0xff]  ;;  %s1484_s23 = scalar_lea.vmem [#allocation8], %s801_s21  ;;  %s1629_s11 = scalar_lea.hbm %s1701_s3, %s842_s26 }
  0x73   : > { %878 = vmatprep.mubr.msk.f32.mxu0 %vm275_vm1, %v235_v1  ;;  %902 = vmatprep.mubr.msk.f32.mxu1 %vm275_vm1, %v251_v2  ;;  %v238_v7 = vld [vmem:[%s1403_s8 + $0x18] sm:$0xff]  ;;  %v239_v9 = vld [vmem:[%s1403_s8 + $0x20] sm:$0xff]  ;;  %v240_v11 = vld [vmem:[%s1403_s8 + $0x28] sm:$0xff]  ;;  %s682_s29 = sshll.u32 %s1484_s23, 4  ;;  %s666_s18 = scalar_lea.sflag [#allocation4], %s1399_s7  ;;  %s1631_s29 = int_to_ptr.vmem [resolvable:$true] %s682_s29 }
  0x74   : > { %879 = vmatmul.mubr.msk.f32.vlgmr.msra.gmra.mrb[0].mxu0 %vm275_vm1, %v236_v3  ;;  %903 = vmatmul.mubr.msk.f32.vlgmr.msra.gmra.mrb[0].mxu1 %vm275_vm1, %v252_v4  ;;  %v254_v8 = vld [vmem:[%s1403_s8 + $0x98] sm:$0xff]  ;;  %v255_v10 = vld [vmem:[%s1403_s8 + $0xa0] sm:$0xff]  ;;  %v256_v12 = vld [vmem:[%s1403_s8 + $0xa8] sm:$0xff]  ;;  %s1101_s20 = scalar_lea.vmem %s1631_s29, 8192  ;;  %p1720_p10 = scmp.ne.s32.totalorder %s1711_s24, 0 }
  0x75   : > { %881 = vmatprep.mubr.msk.f32.mxu0 %vm275_vm1, %v237_v5  ;;  %905 = vmatprep.mubr.msk.f32.mxu1 %vm275_vm1, %v253_v6  ;;  %v241_v13 = vld [vmem:[%s1403_s8 + $0x30] sm:$0xff]  ;;  %v242_v15 = vld [vmem:[%s1403_s8 + $0x38] sm:$0xff]  ;;  %v243_v17 = vld [vmem:[%s1403_s8 + $0x40] sm:$0xff]  ;;  %p1102_p5 = scmp.ne.s32.totalorder %s1631_s29, %s1101_s20  ;;  %s1194_s30 = smov [#allocation8]  }
  0x76   : > { %v257_v14 = vld [vmem:[%s1403_s8 + $0xb0] sm:$0xff]  ;;  %v258_v16 = vld [vmem:[%s1403_s8 + $0xb8] sm:$0xff]  ;;  %v259_v18 = vld [vmem:[%s1403_s8 + $0xc0] sm:$0xff]  ;;  %s1105_s10 = sshll.u32 %s1194_s30, 4  ;;  %s1106_s10 = int_to_ptr.vmem [resolvable:$false] %s1105_s10 }
  0x77   : > { %v244_v19 = vld [vmem:[%s1403_s8 + $0x48] sm:$0xff]  ;;  %v245_v21 = vld [vmem:[%s1403_s8 + $0x50] sm:$0xff]  ;;  %v246_v23 = vld [vmem:[%s1403_s8 + $0x58] sm:$0xff]  ;;  %p1103_p11 = pnand %p1102_p5, %p1720_p10  ;;  %s1107_s4 = scalar_lea.vmem %s1106_s10, 16384 }
  0x78   : > { %882 = vmatmul.mubr.msk.f32.gmra.mrb[2].mxu0 %vm275_vm1, %v238_v7  ;;  %906 = vmatmul.mubr.msk.f32.gmra.mrb[2].mxu1 %vm275_vm1, %v254_v8  ;;  %v260_v20 = vld [vmem:[%s1403_s8 + $0xc8] sm:$0xff]  ;;  %v261_v22 = vld [vmem:[%s1403_s8 + $0xd0] sm:$0xff]  ;;  %v262_v24 = vld [vmem:[%s1403_s8 + $0xd8] sm:$0xff]  ;;  %p1108_p0 = scmp.lt.s32.totalorder %s1631_s29, %s1106_s10  ;;  %p1109_p6 = scmp.lt.s32.totalorder %s1107_s4, %s1101_s20 }
  0x79   : > { %884 = vmatprep.mubr.msk.f32.mxu0 %vm275_vm1, %v239_v9  ;;  %908 = vmatprep.mubr.msk.f32.mxu1 %vm275_vm1, %v255_v10  ;;  %v247_v25 = vld [vmem:[%s1403_s8 + $0x60] sm:$0xff]  ;;  %v248_v27 = vld [vmem:[%s1403_s8 + $0x68] sm:$0xff]  ;;  %v249_v29 = vld [vmem:[%s1403_s8 + $0x70] sm:$0xff]  ;;  %p1104_p1 = pneg %p1103_p11 }
  0x7a   : > { %v263_v26 = vld [vmem:[%s1403_s8 + $0xe0] sm:$0xff]  ;;  %v264_v28 = vld [vmem:[%s1403_s8 + $0xe8] sm:$0xff]  ;;  %v265_v30 = vld [vmem:[%s1403_s8 + $0xf0] sm:$0xff]  ;;  %p1110_p2 = por %p1109_p6, %p1108_p0 }
  0x7b   : > { %v250_v31 = vld [vmem:[%s1403_s8 + $0x78] sm:$0xff]  ;;  %v1478_v33 = vld [vmem:[#allocation7] ss:$0 sm:$0xff] }
  0x7c   : > { %885 = vmatmul.mubr.msk.f32.gmra.mrb[4].mxu0 %vm275_vm1, %v240_v11  ;;  %909 = vmatmul.mubr.msk.f32.gmra.mrb[4].mxu1 %vm275_vm1, %v256_v12  ;;  %v266_v32 = vld [vmem:[%s1403_s8 + $0xf8] sm:$0xff]  ;;  %p1111_p9 = pnand %p1110_p2, %p1104_p1 }
  0x7d   : > { %887 = vmatprep.mubr.msk.f32.mxu0 %vm275_vm1, %v241_v13  ;;  %911 = vmatprep.mubr.msk.f32.mxu1 %vm275_vm1, %v257_v14 }
  0x80   : > { %888 = vmatmul.mubr.msk.f32.gmra.mrb[6].mxu0 %vm275_vm1, %v242_v15  ;;  %912 = vmatmul.mubr.msk.f32.gmra.mrb[6].mxu1 %vm275_vm1, %v258_v16 }
  0x81   : > { %890 = vmatprep.mubr.msk.f32.mxu0 %vm275_vm1, %v243_v17  ;;  %914 = vmatprep.mubr.msk.f32.mxu1 %vm275_vm1, %v259_v18 }
  0x84   : > { %891 = vmatmul.mubr.msk.f32.gmra.mrb[8].mxu0 %vm275_vm1, %v244_v19  ;;  %915 = vmatmul.mubr.msk.f32.gmra.mrb[8].mxu1 %vm275_vm1, %v260_v20 }
  0x85   : > { %893 = vmatprep.mubr.msk.f32.mxu0 %vm275_vm1, %v245_v21  ;;  %917 = vmatprep.mubr.msk.f32.mxu1 %vm275_vm1, %v261_v22 }
  0x88   : > { %894 = vmatmul.mubr.msk.f32.gmra.mrb[10].mxu0 %vm275_vm1, %v246_v23  ;;  %918 = vmatmul.mubr.msk.f32.gmra.mrb[10].mxu1 %vm275_vm1, %v262_v24 }
  0x89   : > { %896 = vmatprep.mubr.msk.f32.mxu0 %vm275_vm1, %v247_v25  ;;  %920 = vmatprep.mubr.msk.f32.mxu1 %vm275_vm1, %v263_v26 }
  0x8c   : > { %897 = vmatmul.mubr.msk.f32.gmra.mrb[12].mxu0 %vm275_vm1, %v248_v27  ;;  %921 = vmatmul.mubr.msk.f32.gmra.mrb[12].mxu1 %vm275_vm1, %v264_v28 }
  0x8d   : > { %899 = vmatprep.mubr.msk.f32.mxu0 %vm275_vm1, %v249_v29  ;;  %923 = vmatprep.mubr.msk.f32.mxu1 %vm275_vm1, %v265_v30 }
  0x90   : > { %900 = vmatmul.mubr.msk.f32.gmra.mrb[14].mxu0 %vm275_vm1, %v250_v31  ;;  %924 = vmatmul.mubr.msk.f32.gmra.mrb[14].mxu1 %vm275_vm1, %v266_v32 }
 0x147   : > { %v880_v34 = vpop.f32.mrb[0].mxu0  ;;  %v904_v35 = vpop.f32.mrb[0].mxu1 }
 0x148   : > { %v448_v36 = vadd.f32 %v880_v34, %v1478_v33  ;;  %v528_v37 = vadd.f32 %v904_v35, %v1478_v33  ;;  %v442_v38 = vpop.f32.mrb[1].mxu0  ;;  %v522_v39 = vpop.f32.mrb[1].mxu1 }
 0x149   : > { %v443_v40 = vadd.f32 %v1478_v33, %v442_v38  ;;  %v523_v41 = vadd.f32 %v1478_v33, %v522_v39 }
 0x14a   : > { %602 = vst.msk [vmem:[%s1484_s23 + $0x8] sm:$0xff] %vm275_vm1, %v448_v36  ;;  %604 = vst.msk [vmem:[%s1484_s23 + $0x18] sm:$0xff] %vm275_vm1, %v448_v36 }
 0x14b   : > { %634 = vst.msk [vmem:[%s1484_s23 + $0x108] sm:$0xff] %vm275_vm1, %v528_v37  ;;  %636 = vst.msk [vmem:[%s1484_s23 + $0x118] sm:$0xff] %vm275_vm1, %v528_v37  ;;  %v883_v42 = vpop.f32.mrb[2].mxu0  ;;  %v907_v43 = vpop.f32.mrb[2].mxu1 }
 0x14c   : > { %601 = vst.msk [vmem:[%s1484_s23] sm:$0xff] %vm275_vm1, %v443_v40  ;;  %603 = vst.msk [vmem:[%s1484_s23 + $0x10] sm:$0xff] %vm275_vm1, %v443_v40  ;;  %v458_v44 = vadd.f32 %v883_v42, %v1478_v33  ;;  %v538_v45 = vadd.f32 %v907_v43, %v1478_v33  ;;  %v452_v46 = vpop.f32.mrb[3].mxu0  ;;  %v532_v47 = vpop.f32.mrb[3].mxu1 }
 0x14d   : > { %633 = vst.msk [vmem:[%s1484_s23 + $0x100] sm:$0xff] %vm275_vm1, %v523_v41  ;;  %635 = vst.msk [vmem:[%s1484_s23 + $0x110] sm:$0xff] %vm275_vm1, %v523_v41  ;;  %v453_v48 = vadd.f32 %v1478_v33, %v452_v46  ;;  %v533_v49 = vadd.f32 %v1478_v33, %v532_v47 }
 0x14e   : > { %606 = vst.msk [vmem:[%s1484_s23 + $0x28] sm:$0xff] %vm275_vm1, %v458_v44  ;;  %608 = vst.msk [vmem:[%s1484_s23 + $0x38] sm:$0xff] %vm275_vm1, %v458_v44 }
 0x14f   : > { %638 = vst.msk [vmem:[%s1484_s23 + $0x128] sm:$0xff] %vm275_vm1, %v538_v45  ;;  %640 = vst.msk [vmem:[%s1484_s23 + $0x138] sm:$0xff] %vm275_vm1, %v538_v45  ;;  %v886_v50 = vpop.f32.mrb[4].mxu0  ;;  %v910_v51 = vpop.f32.mrb[4].mxu1 }
 0x150   : > { %605 = vst.msk [vmem:[%s1484_s23 + $0x20] sm:$0xff] %vm275_vm1, %v453_v48  ;;  %607 = vst.msk [vmem:[%s1484_s23 + $0x30] sm:$0xff] %vm275_vm1, %v453_v48  ;;  %v468_v52 = vadd.f32 %v886_v50, %v1478_v33  ;;  %v548_v53 = vadd.f32 %v910_v51, %v1478_v33  ;;  %v462_v54 = vpop.f32.mrb[5].mxu0  ;;  %v542_v55 = vpop.f32.mrb[5].mxu1 }
 0x151   : > { %637 = vst.msk [vmem:[%s1484_s23 + $0x120] sm:$0xff] %vm275_vm1, %v533_v49  ;;  %639 = vst.msk [vmem:[%s1484_s23 + $0x130] sm:$0xff] %vm275_vm1, %v533_v49  ;;  %v463_v56 = vadd.f32 %v1478_v33, %v462_v54  ;;  %v543_v57 = vadd.f32 %v1478_v33, %v542_v55 }
 0x152   : > { %610 = vst.msk [vmem:[%s1484_s23 + $0x48] sm:$0xff] %vm275_vm1, %v468_v52  ;;  %612 = vst.msk [vmem:[%s1484_s23 + $0x58] sm:$0xff] %vm275_vm1, %v468_v52 }
 0x153   : > { %642 = vst.msk [vmem:[%s1484_s23 + $0x148] sm:$0xff] %vm275_vm1, %v548_v53  ;;  %644 = vst.msk [vmem:[%s1484_s23 + $0x158] sm:$0xff] %vm275_vm1, %v548_v53  ;;  %v889_v58 = vpop.f32.mrb[6].mxu0  ;;  %v913_v59 = vpop.f32.mrb[6].mxu1 }
 0x154   : > { %609 = vst.msk [vmem:[%s1484_s23 + $0x40] sm:$0xff] %vm275_vm1, %v463_v56  ;;  %611 = vst.msk [vmem:[%s1484_s23 + $0x50] sm:$0xff] %vm275_vm1, %v463_v56  ;;  %v478_v60 = vadd.f32 %v889_v58, %v1478_v33  ;;  %v558_v61 = vadd.f32 %v913_v59, %v1478_v33  ;;  %v472_v62 = vpop.f32.mrb[7].mxu0  ;;  %v552_v63 = vpop.f32.mrb[7].mxu1 }
 0x155   : > { %641 = vst.msk [vmem:[%s1484_s23 + $0x140] sm:$0xff] %vm275_vm1, %v543_v57  ;;  %643 = vst.msk [vmem:[%s1484_s23 + $0x150] sm:$0xff] %vm275_vm1, %v543_v57  ;;  %v473_v0 = vadd.f32 %v1478_v33, %v472_v62  ;;  %v553_v1 = vadd.f32 %v1478_v33, %v552_v63 }
 0x156   : > { %614 = vst.msk [vmem:[%s1484_s23 + $0x68] sm:$0xff] %vm275_vm1, %v478_v60  ;;  %616 = vst.msk [vmem:[%s1484_s23 + $0x78] sm:$0xff] %vm275_vm1, %v478_v60 }
 0x157   : > { %646 = vst.msk [vmem:[%s1484_s23 + $0x168] sm:$0xff] %vm275_vm1, %v558_v61  ;;  %648 = vst.msk [vmem:[%s1484_s23 + $0x178] sm:$0xff] %vm275_vm1, %v558_v61  ;;  %v892_v2 = vpop.f32.mrb[8].mxu0  ;;  %v916_v3 = vpop.f32.mrb[8].mxu1 }
 0x158   : > { %613 = vst.msk [vmem:[%s1484_s23 + $0x60] sm:$0xff] %vm275_vm1, %v473_v0  ;;  %615 = vst.msk [vmem:[%s1484_s23 + $0x70] sm:$0xff] %vm275_vm1, %v473_v0  ;;  %v488_v4 = vadd.f32 %v892_v2, %v1478_v33  ;;  %v568_v5 = vadd.f32 %v916_v3, %v1478_v33  ;;  %v482_v6 = vpop.f32.mrb[9].mxu0  ;;  %v562_v7 = vpop.f32.mrb[9].mxu1 }
 0x159   : > { %645 = vst.msk [vmem:[%s1484_s23 + $0x160] sm:$0xff] %vm275_vm1, %v553_v1  ;;  %647 = vst.msk [vmem:[%s1484_s23 + $0x170] sm:$0xff] %vm275_vm1, %v553_v1  ;;  %v483_v8 = vadd.f32 %v1478_v33, %v482_v6  ;;  %v563_v9 = vadd.f32 %v1478_v33, %v562_v7 }
 0x15a   : > { %618 = vst.msk [vmem:[%s1484_s23 + $0x88] sm:$0xff] %vm275_vm1, %v488_v4  ;;  %620 = vst.msk [vmem:[%s1484_s23 + $0x98] sm:$0xff] %vm275_vm1, %v488_v4 }
 0x15b   : > { %650 = vst.msk [vmem:[%s1484_s23 + $0x188] sm:$0xff] %vm275_vm1, %v568_v5  ;;  %652 = vst.msk [vmem:[%s1484_s23 + $0x198] sm:$0xff] %vm275_vm1, %v568_v5  ;;  %v895_v10 = vpop.f32.mrb[10].mxu0  ;;  %v919_v11 = vpop.f32.mrb[10].mxu1 }
 0x15c   : > { %617 = vst.msk [vmem:[%s1484_s23 + $0x80] sm:$0xff] %vm275_vm1, %v483_v8  ;;  %619 = vst.msk [vmem:[%s1484_s23 + $0x90] sm:$0xff] %vm275_vm1, %v483_v8  ;;  %v498_v12 = vadd.f32 %v895_v10, %v1478_v33  ;;  %v578_v13 = vadd.f32 %v919_v11, %v1478_v33  ;;  %v492_v14 = vpop.f32.mrb[11].mxu0  ;;  %v572_v15 = vpop.f32.mrb[11].mxu1 }
 0x15d   : > { %649 = vst.msk [vmem:[%s1484_s23 + $0x180] sm:$0xff] %vm275_vm1, %v563_v9  ;;  %651 = vst.msk [vmem:[%s1484_s23 + $0x190] sm:$0xff] %vm275_vm1, %v563_v9  ;;  %v493_v16 = vadd.f32 %v1478_v33, %v492_v14  ;;  %v573_v17 = vadd.f32 %v1478_v33, %v572_v15 }
 0x15e   : > { %622 = vst.msk [vmem:[%s1484_s23 + $0xa8] sm:$0xff] %vm275_vm1, %v498_v12  ;;  %624 = vst.msk [vmem:[%s1484_s23 + $0xb8] sm:$0xff] %vm275_vm1, %v498_v12 }
 0x15f   : > { %654 = vst.msk [vmem:[%s1484_s23 + $0x1a8] sm:$0xff] %vm275_vm1, %v578_v13  ;;  %656 = vst.msk [vmem:[%s1484_s23 + $0x1b8] sm:$0xff] %vm275_vm1, %v578_v13  ;;  %v898_v18 = vpop.f32.mrb[12].mxu0  ;;  %v922_v19 = vpop.f32.mrb[12].mxu1 }
 0x160   : > { %621 = vst.msk [vmem:[%s1484_s23 + $0xa0] sm:$0xff] %vm275_vm1, %v493_v16  ;;  %623 = vst.msk [vmem:[%s1484_s23 + $0xb0] sm:$0xff] %vm275_vm1, %v493_v16  ;;  %v508_v20 = vadd.f32 %v898_v18, %v1478_v33  ;;  %v588_v21 = vadd.f32 %v922_v19, %v1478_v33  ;;  %v502_v22 = vpop.f32.mrb[13].mxu0  ;;  %v582_v23 = vpop.f32.mrb[13].mxu1 }
 0x161   : > { %653 = vst.msk [vmem:[%s1484_s23 + $0x1a0] sm:$0xff] %vm275_vm1, %v573_v17  ;;  %655 = vst.msk [vmem:[%s1484_s23 + $0x1b0] sm:$0xff] %vm275_vm1, %v573_v17  ;;  %v503_v24 = vadd.f32 %v1478_v33, %v502_v22  ;;  %v583_v25 = vadd.f32 %v1478_v33, %v582_v23 }
 0x162   : > { %626 = vst.msk [vmem:[%s1484_s23 + $0xc8] sm:$0xff] %vm275_vm1, %v508_v20  ;;  %628 = vst.msk [vmem:[%s1484_s23 + $0xd8] sm:$0xff] %vm275_vm1, %v508_v20 }
 0x163   : > { %658 = vst.msk [vmem:[%s1484_s23 + $0x1c8] sm:$0xff] %vm275_vm1, %v588_v21  ;;  %660 = vst.msk [vmem:[%s1484_s23 + $0x1d8] sm:$0xff] %vm275_vm1, %v588_v21  ;;  %v901_v26 = vpop.f32.mrb[14].mxu0  ;;  %v925_v27 = vpop.f32.mrb[14].mxu1 }
 0x164   : > { %625 = vst.msk [vmem:[%s1484_s23 + $0xc0] sm:$0xff] %vm275_vm1, %v503_v24  ;;  %627 = vst.msk [vmem:[%s1484_s23 + $0xd0] sm:$0xff] %vm275_vm1, %v503_v24  ;;  %v518_v28 = vadd.f32 %v901_v26, %v1478_v33  ;;  %v598_v29 = vadd.f32 %v925_v27, %v1478_v33  ;;  %v512_v30 = vpop.f32.mrb[15].mxu0  ;;  %v592_v31 = vpop.f32.mrb[15].mxu1 }
 0x165   : > { %657 = vst.msk [vmem:[%s1484_s23 + $0x1c0] sm:$0xff] %vm275_vm1, %v583_v25  ;;  %659 = vst.msk [vmem:[%s1484_s23 + $0x1d0] sm:$0xff] %vm275_vm1, %v583_v25  ;;  %v513_v32 = vadd.f32 %v1478_v33, %v512_v30  ;;  %v593_v34 = vadd.f32 %v1478_v33, %v592_v31 }
 0x166   : > { %630 = vst.msk [vmem:[%s1484_s23 + $0xe8] sm:$0xff] %vm275_vm1, %v518_v28  ;;  %632 = vst.msk [vmem:[%s1484_s23 + $0xf8] sm:$0xff] %vm275_vm1, %v518_v28 }
 0x167   : > { %662 = vst.msk [vmem:[%s1484_s23 + $0x1e8] sm:$0xff] %vm275_vm1, %v598_v29  ;;  %664 = vst.msk [vmem:[%s1484_s23 + $0x1f8] sm:$0xff] %vm275_vm1, %v598_v29 }
 0x168   : > { %629 = vst.msk [vmem:[%s1484_s23 + $0xe0] sm:$0xff] %vm275_vm1, %v513_v32  ;;  %631 = vst.msk [vmem:[%s1484_s23 + $0xf0] sm:$0xff] %vm275_vm1, %v513_v32 }
 0x169   : > { %661 = vst.msk [vmem:[%s1484_s23 + $0x1e0] sm:$0xff] %vm275_vm1, %v593_v34  ;;  %663 = vst.msk [vmem:[%s1484_s23 + $0x1f0] sm:$0xff] %vm275_vm1, %v593_v34 }
 0x16a   : > { %1114 = shalt.err (!%p1111_p9)
}
 0x16b   : > { %s1115_s19 = scalar_lea.hbm %s1629_s11, 8192  ;;  %s1119_s5 = scalar_lea.hbm %s1701_s3, 16384 }
 0x16c   : > { %p1116_p8 = scmp.ne.s32.totalorder %s1629_s11, %s1115_s19  ;;  %p1120_p7 = scmp.lt.u32.totalorder %s1629_s11, %s1701_s3 }
 0x16d   : > { %p1121_p12 = scmp.lt.u32.totalorder %s1119_s5, %s1115_s19  ;;  %p1123_p5 = scmp.lt.u32.totalorder %s1115_s19, %s1629_s11 }
 0x16e   : > { %p1117_p13 = pnand %p1116_p8, %p1720_p10 }
 0x16f   : > { %p1122_p3 = por %p1121_p12, %p1120_p7 }
 0x170   : > { %p1118_p4 = pneg %p1117_p13 }
 0x171   : > { %p1124_p11 = por %p1123_p5, %p1122_p3 }
 0x173   : > { %p1125_p1 = pnand %p1124_p11, %p1118_p4 }
 0x175   : > { %1128 = shalt.err (!%p1125_p1)
}
 0x176   : > { %s1195_s23 = smov 128   ;;  %s1196_s26 = smov 8  }
 0x177   : > { %938 = dma.vmem_to_hbm [thread:$0]  (%p1720_p10), %s1631_s29, 8192, %s1629_s11, %s666_s18, %s1195_s23, %s1195_s23, %s1196_s26  }
 0x178 PF: > { %s697_s15 = sand.u32 1, %s1167_s12   ;;  %p1721_p0 = scmp.ne.s32.totalorder %s1712_s25, 0 }
 0x179   : > { %p1722_p6 = scmp.ge.s32.totalorder %s1187_s17, 2  ;;  %s698_s9 = scalar_lea.sflag [#allocation4], %s697_s15 }
 0x17b   : > { %p952_p2 = pnand %p1722_p6, %p1721_p0 }
 0x17d   : > { %1162 = dma.done.wait (!%p952_p2), %s698_s9, 8192  }
 0x17e   : > { %1164 = vsyncadd (!%p952_p2), %s698_s9, 4294959104  ;;  %s20_s17 = sadd.s32 1, %s1187_s17   ;;  %s1723_s12 = smov %s1171_s13 }
 0x17f   : > { %p17_p9 = scmp.ge.s32.totalorder %s20_s17, 4   ;;  %s1724_s13 = smov %s1175_s14 }
 0x180   : > { %s1725_s14 = smov %s1366_s28  ;;  %s1726_s15 = smov %s1183_s16 }
 0x181   : > { %s1727_s16 = smov %s1729_s27  ;;  %19 = sbr.rel (!%p17_p9) target bundleno = 7 (0x7), region = 85 }
 0x188   :  { %703 = vsyncpa [#allocation3], 1 }
 0x189   :  { %705 = vsyncpa [#allocation3 + $0x1], 1 }
 0x18a   :  { %706 = vsyncpa [#allocation6], 1 }
 0x18b   :  { %707 = vsyncpa [#allocation4], 1 }
 0x18c   :  { %709 = vsyncpa [#allocation4 + $0x1], 1 }

</bundles_post_ra>
